<compile_context>
chip_gen: v7x
topology: tpu7x:2x2x1
jax: 0.10.0
libtpu: 0.0.40
codegen_flags: <defaults>
</compile_context>

<pallas_src>
import functools

import jax
import jax.numpy as jnp
from jax.experimental import pallas as pl
from jax.experimental.pallas import tpu as pltpu


def _instance_norm_kernel(x_ref, params_ref, o_ref, *, eps, inv_n):
    # x_ref:      (TR, HW) tile of rows, full reduction axis resident in VMEM
    # params_ref: (TR, 2)  per-row [scale, shift]
    x = x_ref[...].astype(jnp.float32)

    # Single-pass moments (f32 accumulation).
    s1 = jnp.sum(x, axis=-1, keepdims=True)
    s2 = jnp.sum(x * x, axis=-1, keepdims=True)
    mean = s1 * inv_n
    var = jnp.maximum(s2 * inv_n - mean * mean, 0.0)

    inv_std = jax.lax.rsqrt(var + eps)                       # (TR, 1)
    scale = params_ref[:, 0:1].astype(jnp.float32)           # (TR, 1)
    shift = params_ref[:, 1:2].astype(jnp.float32)           # (TR, 1)

    a = inv_std * scale                                      # per-row scalars
    b = shift - mean * a
    o_ref[...] = (x * a + b).astype(o_ref.dtype)


def _vmem_capacity_bytes():
    try:
        return int(pltpu.get_tpu_info().vmem_capacity_bytes)
    except Exception:
        # Conservative fallback (v7x per-TC VMEM).
        return 64 * 1024 * 1024


def _choose_row_tile(rows, hw, itemsize, align):
    """Row-tile size: large streaming blocks, capped by true live-VMEM usage."""
    bytes_per_row = hw * itemsize
    f32_row = hw * 4
    vmem = _vmem_capacity_bytes()

    # Per-step block target: bigger on 128 MiB-VMEM parts (v5e/v6e) where it
    # buys a few extra % of HBM roofline; smaller on v7x's 64 MiB VMEM.
    target_bytes = (8 << 20) if vmem >= (100 << 20) else (4 << 20)
    tr_target = max(align, (target_bytes // bytes_per_row) // align * align)

    # Live VMEM per resident row: double-buffered input + double-buffered
    # output tiles plus ~2 full-tile f32 intermediates inside the body
    # (x upcast + x*x).  Leave 30% headroom.
    live_per_row = 4 * bytes_per_row + 2 * f32_row
    budget = int(vmem * 0.70)
    tr_cap = max(align, (budget // live_per_row) // align * align)

    tr = min(tr_target, tr_cap)

    # Keep the pipeline busy: prefer >= 4 grid steps (>= 2 per TensorCore on
    # v7x) when the row count allows, else at least 2 steps.
    if rows >= 4 * align:
        tr = min(tr, max(align, (rows // 4) // align * align))
    elif rows >= 2 * align:
        half_up = (((rows + 1) // 2) + align - 1) // align * align
        tr = min(tr, max(align, half_up))

    return max(align, tr)


def instance_normalization(x, scale, shift, *, eps=1e-9, row_tile=None):
    """x: (N, C, H, W); scale, shift: (C,). Returns same shape/dtype as x."""
    N, C, H, W = x.shape
    rows = N * C
    hw = H * W
    itemsize = jnp.dtype(x.dtype).itemsize
    # Sublane multiple for this dtype: 8 (f32), 16 (bf16), 32 (int8/fp8).
    align = 8 * max(1, 4 // itemsize)

    # 2-D view: one row per (sample, channel) instance. No padding, no copies.
    x2d = x.reshape(rows, hw)

    # Packed per-row affine params: one small (tr, 2) DMA per grid step.
    params = jnp.stack(
        [jnp.tile(scale.astype(jnp.float32), N),
         jnp.tile(shift.astype(jnp.float32), N)],
        axis=-1,
    )

    # Row tile: multiple of the dtype sublane alignment, or the full row count.
    tr = int(row_tile) if row_tile is not None else _choose_row_tile(
        rows, hw, itemsize, align)
    if tr >= rows:
        tr = rows
    else:
        tr = max(align, (tr // align) * align)
        if tr >= rows:
            tr = rows

    n_blocks = pl.cdiv(rows, tr)  # ragged last block handled by Pallas masking

    # VMEM limit sized to the chosen tile: double-buffered in/out tiles,
    # in-kernel f32 temporaries, the tiny param block, plus slack.
    tile_bytes = tr * hw * itemsize
    f32_tile = tr * hw * 4
    needed = 4 * tile_bytes + 2 * f32_tile + 4 * tr * 2 * 4 + (4 << 20)
    vmem_limit = int(min(_vmem_capacity_bytes(), max(needed, 32 << 20)))

    out2d = pl.pallas_call(
        functools.partial(_instance_norm_kernel, eps=eps, inv_n=1.0 / hw),
        out_shape=jax.ShapeDtypeStruct((rows, hw), x.dtype),
        grid_spec=pltpu.PrefetchScalarGridSpec(
            num_scalar_prefetch=0,
            grid=(n_blocks,),
            in_specs=[
                # Full H*W extent in the last dim (== array dim, so legal even
                # when hw % 128 != 0) -> lane-dense stores, no padded copies.
                pl.BlockSpec((tr, hw), lambda i: (i, 0)),
                pl.BlockSpec((tr, 2), lambda i: (i, 0)),
            ],
            out_specs=pl.BlockSpec((tr, hw), lambda i: (i, 0)),
        ),
        compiler_params=pltpu.CompilerParams(
            dimension_semantics=("parallel",),
            vmem_limit_bytes=vmem_limit,
        ),
    )(x2d, params)

    return out2d.reshape(N, C, H, W)


def _reference(x, scale, shift, eps):
    mean = jnp.mean(x, axis=(2, 3), keepdims=True)
    var = jnp.mean((x - mean) ** 2, axis=(2, 3), keepdims=True)
    out = (x - mean) / jnp.sqrt(var + eps)
    return out * scale[None, :, None, None] + shift[None, :, None, None]


if __name__ == "__main__":
    key = jax.random.PRNGKey(0)
    kx, ks, kx2 = jax.random.split(key, 3)

    # Case 1: HW is a multiple of 128 (lane-aligned fast path).
    N, C, H, W = 2, 4, 16, 16
    x = jax.random.normal(kx, (N, C, H, W), dtype=jnp.float32)
    # Param init mirroring the module: scale ~ uniform(0,1), shift = 0.
    scale = jax.random.uniform(ks, (C,), dtype=jnp.float32)
    shift = jnp.zeros((C,), dtype=jnp.float32)

    out = instance_normalization(x, scale, shift, eps=1e-9)
    out = jax.block_until_ready(out)
    ref = _reference(x, scale, shift, 1e-9)
    assert jnp.allclose(out, ref, atol=1e-5, rtol=1e-5), (
        float(jnp.max(jnp.abs(out - ref)))
    )

    # Case 2: small HW not a multiple of 128 (full-extent last dim, masked
    # tail stores; no padded HBM copy).
    x2 = jax.random.normal(kx2, (N, C, 7, 7), dtype=jnp.float32)
    out2 = instance_normalization(x2, scale, shift, eps=1e-9)
    out2 = jax.block_until_ready(out2)
    ref2 = _reference(x2, scale, shift, 1e-9)
    assert jnp.allclose(out2, ref2, atol=1e-5, rtol=1e-5), (
        float(jnp.max(jnp.abs(out2 - ref2)))
    )

    print("KERNEL_OK")
</pallas_src>

<mosaic_0001>
module attributes {stable_mosaic.version = 11 : i64} {
  func.func @_instance_norm_kernel(%arg0: i32, %arg1: memref<8x256xf32, #tpu.memory_space<vmem>>, %arg2: memref<8x2xf32, #tpu.memory_space<vmem>>, %arg3: memref<8x256xf32, #tpu.memory_space<vmem>>) attributes {dimension_semantics = [#tpu.dimension_semantics<parallel>], iteration_bounds = array<i64: 1>, scalar_prefetch = 0 : i64, scratch_operands = 0 : i64, tpu.core_type = #tpu.core_type<tc>, window_params = [{transform_indices = @transform_0, window_bounds = array<i64: 8, 256>}, {transform_indices = @transform_1, window_bounds = array<i64: 8, 2>}, {transform_indices = @transform_2, window_bounds = array<i64: 8, 256>}]} {
    %c0 = arith.constant 0 : index
    %c0_0 = arith.constant 0 : index
    %0 = vector.load %arg1[%c0, %c0_0] : memref<8x256xf32, #tpu.memory_space<vmem>>, vector<8x256xf32>
    %cst = arith.constant dense<0.000000e+00> : vector<8xf32>
    %1 = vector.multi_reduction <add>, %0, %cst [1] : vector<8x256xf32> to vector<8xf32>
    %2 = vector.shape_cast %1 : vector<8xf32> to vector<8x1xf32>
    %3 = arith.mulf %0, %0 : vector<8x256xf32>
    %cst_1 = arith.constant dense<0.000000e+00> : vector<8xf32>
    %4 = vector.multi_reduction <add>, %3, %cst_1 [1] : vector<8x256xf32> to vector<8xf32>
    %5 = vector.shape_cast %4 : vector<8xf32> to vector<8x1xf32>
    %cst_2 = arith.constant 3.906250e-03 : f32
    %6 = vector.broadcast %cst_2 : f32 to vector<8x1xf32>
    %7 = arith.mulf %2, %6 : vector<8x1xf32>
    %cst_3 = arith.constant 3.906250e-03 : f32
    %8 = vector.broadcast %cst_3 : f32 to vector<8x1xf32>
    %9 = arith.mulf %5, %8 : vector<8x1xf32>
    %10 = arith.mulf %7, %7 : vector<8x1xf32>
    %11 = arith.subf %9, %10 : vector<8x1xf32>
    %cst_4 = arith.constant 0.000000e+00 : f32
    %12 = vector.broadcast %cst_4 : f32 to vector<8x1xf32>
    %13 = arith.maximumf %11, %12 : vector<8x1xf32>
    %cst_5 = arith.constant 9.99999971E-10 : f32
    %14 = vector.broadcast %cst_5 : f32 to vector<8x1xf32>
    %15 = arith.addf %13, %14 : vector<8x1xf32>
    %16 = math.rsqrt %15 : vector<8x1xf32>
    %c0_6 = arith.constant 0 : index
    %c0_7 = arith.constant 0 : index
    %17 = vector.load %arg2[%c0_6, %c0_7] : memref<8x2xf32, #tpu.memory_space<vmem>>, vector<8x1xf32>
    %c0_8 = arith.constant 0 : index
    %c1 = arith.constant 1 : index
    %18 = vector.load %arg2[%c0_8, %c1] : memref<8x2xf32, #tpu.memory_space<vmem>>, vector<8x1xf32>
    %19 = arith.mulf %16, %17 : vector<8x1xf32>
    %20 = arith.mulf %7, %19 : vector<8x1xf32>
    %21 = arith.subf %18, %20 : vector<8x1xf32>
    %22 = vector.broadcast %19 : vector<8x1xf32> to vector<8x256xf32>
    %23 = arith.mulf %0, %22 : vector<8x256xf32>
    %24 = vector.broadcast %21 : vector<8x1xf32> to vector<8x256xf32>
    %25 = arith.addf %23, %24 : vector<8x256xf32>
    %c0_9 = arith.constant 0 : index
    %c0_10 = arith.constant 0 : index
    %26 = vector.load %arg3[%c0_9, %c0_10] : memref<8x256xf32, #tpu.memory_space<vmem>>, vector<8x256xf32>
    tpu.vector_store %arg3[%c0_9, %c0_10], %25 {strides = array<i32>} : memref<8x256xf32, #tpu.memory_space<vmem>>, vector<8x256xf32>,
    return
  }
  func.func @transform_0(%arg0: i32) -> (i32, i32) {
    %c0_i32 = arith.constant 0 : i32
    %c0_i32_0 = arith.constant 0 : i32
    return %arg0, %c0_i32 : i32, i32
  }
  func.func @transform_1(%arg0: i32) -> (i32, i32) {
    %c0_i32 = arith.constant 0 : i32
    %c0_i32_0 = arith.constant 0 : i32
    return %arg0, %c0_i32 : i32, i32
  }
  func.func @transform_2(%arg0: i32) -> (i32, i32) {
    %c0_i32 = arith.constant 0 : i32
    %c0_i32_0 = arith.constant 0 : i32
    return %arg0, %c0_i32 : i32, i32
  }
}

</mosaic_0001>

<bundles_post_ra>
// kernel: tpu_custom_call.1
= control target key start
LH: loop header
LB: loop body
LE: loop exit
PB: predicated region body
PF: predicated region fallthrough
CT: control target
= control target key end

     0   :  { %7 = vsyncpa [#allocation3], 0  ;;  %s184_s0 = inlined_call_operand.hbm [shape: f32[8,256], index: 0, kind: input, shape index: {}]   ;;  %s185_s1 = inlined_call_operand.vmem [shape: f32[8,2], index: 1, kind: input, shape index: {}]   ;;  %s186_s2 = inlined_call_operand.hbm [shape: f32[8,256], index: 2, kind: output, shape index: {}]  }
   0x1   :  { %8 = vsyncpa [#allocation4], 0  ;;  %s137_s9 = smov [#allocation2]   ;;  %s89_s13 = scalar_lea.hbm %s184_s0, 256 }
   0x2   :  { %s15_s10 = sshll.u32 %s137_s9, 4  ;;  %p90_p0 = scmp.ne.s32.totalorder %s184_s0, %s89_s13  ;;  %s16_s10 = int_to_ptr.vmem [resolvable:$true] %s15_s10 }
   0x3   :  { %p93_p1 = scmp.lt.u32.totalorder %s89_s13, %s184_s0 }
   0x5   :  { %p95_p2 = pnand %p93_p1, %p90_p0 }
   0x7   :  { %98 = shalt.err (!%p95_p2)
}
   0x8   :  { %s99_s18 = scalar_lea.vmem %s16_s10, 256  ;;  %p104_p4 = scmp.lt.s32.totalorder %s16_s10, %s16_s10 }
   0x9   :  { %p100_p3 = scmp.ne.s32.totalorder %s16_s10, %s99_s18  ;;  %p105_p5 = scmp.lt.s32.totalorder %s99_s18, %s99_s18 }
   0xb   :  { %p106_p6 = por %p105_p5, %p104_p4 }
   0xd   :  { %p107_p7 = pnand %p106_p6, %p100_p3 }
   0xf   :  { %110 = shalt.err (!%p107_p7)
}
  0x10   :  { %18 = dma.hbm_to_vmem [thread:$0]  %s184_s0, 256, %s16_s10, [#allocation3]  }
  0x11   :  { %133 = dma.done.wait [#allocation3], 256  }
  0x12   :  { %134 = vsyncadd [#allocation3], 4294967040  ;;  %v24_v0 = vld [vmem:[#allocation2] sm:$0xff]  ;;  %v25_v1 = vld [vmem:[#allocation2 + $0x8] sm:$0xff]  ;;  %v138_v6 = vmov 0   ;;  %v139_v15 = vmov 1  }
  0x13   :  { %v26_v2 = vadd.f32 %v25_v1, %v24_v0  ;;  %v29_v3 = vmul.f32 %v24_v0, %v24_v0  ;;  %v30_v4 = vmul.f32 %v25_v1, %v25_v1  ;;  %85 = vset.pattern.permute.xlu1 %v138_v6  ;;  %86 = vset.pattern.permute.xlu0 %v139_v15  ;;  %v41_v16 = vld [vmem:[%s185_s1] sm:$0xff]  ;;  %s140_s22 = smov 1   ;;  %s141_s23 = smov [#allocation5]  }
  0x14   :  { %s71_s24 = sshll.u32 %s141_s23, 4  ;;  %s72_s24 = int_to_ptr.vmem [resolvable:$true] %s71_s24 }
  0x15   :  { %27 = vadd.xlane.f32.xlu0 %v26_v2  ;;  %v31_v5 = vadd.f32 %v30_v4, %v29_v3  ;;  %s111_s1 = scalar_lea.vmem %s72_s24, 256  ;;  %p116_p9 = scmp.lt.s32.totalorder %s72_s24, %s72_s24 }
  0x16   :  { %p112_p8 = scmp.ne.s32.totalorder %s72_s24, %s111_s1  ;;  %p117_p10 = scmp.lt.s32.totalorder %s111_s1, %s111_s1 }
  0x18   :  { %p118_p11 = por %p117_p10, %p116_p9 }
  0x19   :  { %32 = vadd.xlane.f32.xlu0 %v31_v5 }
  0x1a   :  { %p119_p12 = pnand %p118_p11, %p112_p8 }
  0xa2   :  { %v28_v7 = vpop.xlane.xlu0 %27 }
  0xa3   :  { %v34_v8 = vmul.f32 0.00390625, %v28_v7 }
  0xa5   :  { %v36_v10 = vmul.f32 %v34_v8, %v34_v8 }
  0xa6   :  { %v33_v9 = vpop.xlane.xlu0 %32 }
  0xa7   :  { %v35_v11 = vmul.f32 0.00390625, %v33_v9 }
  0xa9   :  { %v37_v12 = vsub.f32 %v35_v11, %v36_v10 }
  0xab   :  { %v38_v13 = vmax.f32 %v37_v12, 0.0 }
  0xad   :  { %v39_v14 = vadd.f32 1e-09, %v38_v13 }
  0xaf   :  { %87 = vrsqrt.f32 %v39_v14 }
  0xb9   :  { %v88_v17 = vpop.eup %87 }
  0xba   :  { %v42_v18 = vmul.f32 %v88_v17, %v41_v16 }
  0xbc   :  { %v43_v19 = vmul.f32 %v42_v18, %v34_v8 }
  0xbe   :  { %45 = vrot.lane.b32.xlu1 %v43_v19, %s140_s22 }
  0xc2   :  { %51 = vperm.xlu1 %85, %v42_v18  }
 0x130   :  { %v46_v20 = vpop.permute.xlu1 %45 }
 0x131   :  { %v48_v21 = vsub.f32 %v41_v16, %v46_v20 }
 0x133   :  { %58 = vperm.xlu0 %86, %v48_v21  }
 0x141   :  { %v52_v22 = vpop.permute.xlu1 %51 }
 0x142   :  { %v54_v23 = vmul.f32 %v52_v22, %v24_v0  ;;  %v55_v24 = vmul.f32 %v52_v22, %v25_v1 }
 0x1b2   :  { %v59_v25 = vpop.permute.xlu0 %58 }
 0x1b3   :  { %v61_v26 = vadd.f32 %v59_v25, %v54_v23  ;;  %v62_v27 = vadd.f32 %v59_v25, %v55_v24 }
 0x1b5   :  { %63 = vst [vmem:[#allocation5] sm:$0xff] %v61_v26  ;;  %64 = vst [vmem:[#allocation5 + $0x8] sm:$0xff] %v62_v27 }
 0x1b6   :  { %122 = shalt.err (!%p119_p12)
}
 0x1b7   :  { %s123_s27 = scalar_lea.hbm %s186_s2, 256 }
 0x1b8   :  { %p124_p13 = scmp.ne.s32.totalorder %s186_s2, %s123_s27  ;;  %p127_p0 = scmp.lt.u32.totalorder %s123_s27, %s186_s2 }
 0x1ba   :  { %p129_p1 = pnand %p127_p0, %p124_p13 }
 0x1bc   :  { %132 = shalt.err (!%p129_p1)
}
 0x1bd   :  { %74 = dma.vmem_to_hbm [thread:$0]  %s72_s24, 256, %s186_s2, [#allocation4]  }
 0x1be   :  { %135 = dma.done.wait [#allocation4], 256  }
 0x1bf   :  { %136 = vsyncadd [#allocation4], 4294967040 }
 0x1c0   :  { %78 = vsyncpa [#allocation3], 1 }
 0x1c1   :  { %79 = vsyncpa [#allocation4], 1 }

</bundles_post_ra>
